<compile_context>
chip_gen: v7x
topology: tpu7x:2x2x1
jax: 0.10.0
libtpu: 0.0.40
codegen_flags: <defaults>
</compile_context>

<pallas_src>
import functools

import jax
import jax.numpy as jnp
import numpy as np
from jax.experimental import pallas as pl
from jax.experimental.pallas import tpu as pltpu

MATMUL_DTYPE = jnp.bfloat16   # bf16 MXU inputs, f32 accumulation.
C_PAD = 16                    # conv3's 10 output channels padded to 16 (zeros).
OUT_PAD = 128                 # lane-dense output width; logits live in [:, :10].


def _cdiv(a, b):
    return -(-a // b)


def _round_up(v, m):
    return _cdiv(v, m) * m


# ---------------------------------------------------------------------------
# Fused Pallas kernel (one batch tile of g samples):
#   banded x (14g, 84) -> conv1 -> conv2 -> conv3 -> 4x4 avg pool -> (g, 128)
# ---------------------------------------------------------------------------
def _fused_mnist_kernel(x1_ref, w1_ref, b1_ref,
                        w20_ref, w21_ref, w22_ref, b2_ref,
                        w30_ref, w31_ref, w32_ref, b3_ref,
                        pool_ref, out_ref, *, g):
    dt = w1_ref.dtype

    def img_row(h, i, n_rows):
        # All samples' activation for image-row i (i-major layout).  Rows
        # outside [0, n_rows) are the conv's zero padding.
        if i < 0 or i >= n_rows:
            return jnp.zeros((g, h.shape[1]), h.dtype)
        return h[i * g:(i + 1) * g, :]

    # conv1: ONE matmul over all 14 output rows (M = 14g, K = 84, N = 224).
    h1 = jnp.dot(x1_ref[...], w1_ref[...], preferred_element_type=jnp.float32)
    h1 = jnp.maximum(h1 + b1_ref[...], 0.0).astype(dt)            # (14g, 224)

    # conv2: 3 matmuls (one per kernel row), batched over the 7 output rows.
    w2 = (w20_ref[...], w21_ref[...], w22_ref[...])
    acc2 = None
    for r in range(3):
        x2r = jnp.concatenate(
            [img_row(h1, 2 * j - 1 + r, 14) for j in range(7)], axis=0)  # (7g, 224)
        d = jnp.dot(x2r, w2[r], preferred_element_type=jnp.float32)
        acc2 = d if acc2 is None else acc2 + d
    h2 = jnp.maximum(acc2 + b2_ref[...], 0.0).astype(dt)          # (7g, 112)

    # conv3: same scheme over 4 output rows (row index 7 hits the zero pad).
    w3 = (w30_ref[...], w31_ref[...], w32_ref[...])
    acc3 = None
    for r in range(3):
        x3r = jnp.concatenate(
            [img_row(h2, 2 * k - 1 + r, 7) for k in range(4)], axis=0)   # (4g, 112)
        d = jnp.dot(x3r, w3[r], preferred_element_type=jnp.float32)
        acc3 = d if acc3 is None else acc3 + d
    h3 = jnp.maximum(acc3 + b3_ref[...], 0.0)                     # (4g, 64) f32

    # 4x4 average pool: sum the 4 spatial rows on the VPU, then one tiny bf16
    # matmul that sums the 4 column positions, scales by 1/16 and scatters the
    # 10 real channels into a lane-dense 128-wide output.
    hsum = h3[0:g] + h3[g:2 * g] + h3[2 * g:3 * g] + h3[3 * g:4 * g]   # (g, 64)
    out_ref[...] = jnp.dot(hsum.astype(dt), pool_ref[...],
                           preferred_element_type=jnp.float32
                           ).astype(out_ref.dtype)                # (g, 128)


# ---------------------------------------------------------------------------
# Weight preparation: banded conv matrices (column zero-padding baked in).
# Activation lane layout everywhere: index = w_col * channels + channel.
# ---------------------------------------------------------------------------
def _band_matrix_full(w, win, wout, cout_pad, dtype):
    # Full 3-kernel-row band -> one output row: (3*win*cin, wout*cout_pad).
    _, _, cin, cout = w.shape
    wc = jnp.arange(win)[:, None] - 2 * jnp.arange(wout)[None, :] + 1
    valid = ((wc >= 0) & (wc < 3)).astype(w.dtype)
    g = w[:, jnp.clip(wc, 0, 2)] * valid[None, :, :, None, None]  # (3,win,wout,cin,cout)
    g = jnp.pad(g, ((0, 0),) * 4 + ((0, cout_pad - cout),))
    return jnp.transpose(g, (0, 1, 3, 2, 4)).reshape(
        3 * win * cin, wout * cout_pad).astype(dtype)


def _band_matrix_krow(w, kr, win, wout, cout_pad, dtype):
    # Kernel row `kr` of the band -> one output row: (win*cin, wout*cout_pad).
    _, _, cin, cout = w.shape
    wc = jnp.arange(win)[:, None] - 2 * jnp.arange(wout)[None, :] + 1
    valid = ((wc >= 0) & (wc < 3)).astype(w.dtype)
    g = w[kr][jnp.clip(wc, 0, 2)] * valid[:, :, None, None]       # (win,wout,cin,cout)
    g = jnp.pad(g, ((0, 0),) * 3 + ((0, cout_pad - cout),))
    return jnp.transpose(g, (0, 2, 1, 3)).reshape(
        win * cin, wout * cout_pad).astype(dtype)


def _bias_row(b, wout, cout_pad):
    return jnp.tile(jnp.pad(b, (0, cout_pad - b.shape[0])), wout
                    ).reshape(1, -1).astype(jnp.float32)


def prepare_params(params, matmul_dtype=MATMUL_DTYPE):
    w1, b1 = params["conv1"]
    w2, b2 = params["conv2"]
    w3, b3 = params["conv3"]
    prep = {
        "w1": _band_matrix_full(w1, 28, 14, 16, matmul_dtype),      # (84, 224)
        "b1": _bias_row(b1, 14, 16),                                # (1, 224)
        "b2": _bias_row(b2, 7, 16),                                 # (1, 112)
        "b3": _bias_row(b3, 4, C_PAD),                              # (1, 64)
    }
    for r in range(3):
        prep[f"w2_{r}"] = _band_matrix_krow(w2, r, 14, 7, 16, matmul_dtype)    # (224,112)
        prep[f"w3_{r}"] = _band_matrix_krow(w3, r, 7, 4, C_PAD, matmul_dtype)  # (112,64)
    pool = jnp.tile(jnp.eye(C_PAD, dtype=jnp.float32), (4, 1))[:, :10] / 16.0
    pool = jnp.pad(pool, ((0, 0), (0, OUT_PAD - 10)))
    prep["pool"] = pool.astype(matmul_dtype)                        # (64, 128)
    return prep


# ---------------------------------------------------------------------------
# Forward pass
# ---------------------------------------------------------------------------
def mnist_cnn_forward(x, prep, block_n=256, core_parallel=False):
    # Matches x.view(-1, 1, 28, 28): Cin == 1.
    x = x.reshape(-1, 28, 28).astype(jnp.float32)
    n = x.shape[0]

    # Adaptive batch tile: avoids pathological padding just above a tile
    # boundary, and gives >=2 grid steps (v7x 2-TC split) for large batches.
    n_tiles = _cdiv(n, block_n)
    if n >= 128 and n_tiles < 2:
        n_tiles = 2
    g = _round_up(_cdiv(n, n_tiles), 8)
    n_tiles = _cdiv(n, g)
    n_pad = n_tiles * g
    if n_pad != n:
        x = jnp.pad(x, ((0, n_pad - n), (0, 0), (0, 0)))

    # im2row banding for conv1 (tiny, done once in XLA outside the kernel):
    # per tile, row (image_row i, sample g) holds the 3x28 input band feeding
    # conv1 output row i (zero row padding baked in).  bf16 halves HBM traffic.
    xp = jnp.pad(x, ((0, 0), (1, 1), (0, 0)))                          # (n_pad, 30, 28)
    bands = jnp.stack([xp[:, 2 * i:2 * i + 3, :] for i in range(14)], axis=1)
    x1 = bands.reshape(n_tiles, g, 14, 3 * 28).transpose(0, 2, 1, 3)
    x1 = x1.reshape(n_tiles * 14 * g, 3 * 28).astype(MATMUL_DTYPE)     # (T*14g, 84)

    weights = [prep["w1"], prep["b1"],
               prep["w2_0"], prep["w2_1"], prep["w2_2"], prep["b2"],
               prep["w3_0"], prep["w3_1"], prep["w3_2"], prep["b3"],
               prep["pool"]]

    # Real (banded) arithmetic: ~1.8 MFLOP / sample (dense lowering was ~10.2).
    flops = 2 * n_pad * (14 * 84 * 224 + 3 * 7 * 224 * 112
                         + 3 * 4 * 112 * 64 + 64 * OUT_PAD)
    bytes_accessed = (x1.size * x1.dtype.itemsize
                      + sum(w.size * w.dtype.itemsize for w in weights)
                      + n_pad * OUT_PAD * 4)

    dim_sem = (pltpu.CORE_PARALLEL,) if core_parallel else ("parallel",)

    out = pl.pallas_call(
        functools.partial(_fused_mnist_kernel, g=g),
        out_shape=jax.ShapeDtypeStruct((n_pad, OUT_PAD), jnp.float32),
        grid=(n_tiles,),
        in_specs=[pl.BlockSpec((14 * g, 84), lambda t: (t, 0))] + [
            pl.BlockSpec(w.shape, lambda t: (0, 0)) for w in weights],
        out_specs=pl.BlockSpec((g, OUT_PAD), lambda t: (t, 0)),
        compiler_params=pltpu.CompilerParams(
            dimension_semantics=dim_sem,
            # Weights are only ~0.25 MB now (banded), so no Buffered(1) needed;
            # generous limit still leaves headroom on v7x's 64 MiB VMEM.
            vmem_limit_bytes=48 * 1024 * 1024,
        ),
        cost_estimate=pl.CostEstimate(flops=flops, transcendentals=0,
                                      bytes_accessed=bytes_accessed),
    )(x1, *weights)
    # NOTE: the reference forward() has no return statement (returns None);
    # we return the computed (N, 10) pooled activations, the intended output.
    return out[:n, :10]


# ---------------------------------------------------------------------------
# Parameter init (PyTorch-style uniform, HWIO weight layout) and f32 reference
# ---------------------------------------------------------------------------
def init_params(key):
    def conv_init(k, kh, kw, cin, cout):
        kw_key, kb_key = jax.random.split(k)
        bound = 1.0 / ((cin * kh * kw) ** 0.5)
        w = jax.random.uniform(kw_key, (kh, kw, cin, cout), jnp.float32,
                               -bound, bound)
        b = jax.random.uniform(kb_key, (cout,), jnp.float32, -bound, bound)
        return w, b

    k1, k2, k3 = jax.random.split(key, 3)
    return {
        "conv1": conv_init(k1, 3, 3, 1, 16),
        "conv2": conv_init(k2, 3, 3, 16, 16),
        "conv3": conv_init(k3, 3, 3, 16, 10),
    }


def _reference_forward(x, params):
    x = x.reshape(-1, 28, 28, 1).astype(jnp.float32)
    for name in ("conv1", "conv2", "conv3"):
        w, b = params[name]
        x = jax.lax.conv_general_dilated(
            x, w, window_strides=(2, 2), padding=((1, 1), (1, 1)),
            dimension_numbers=("NHWC", "HWIO", "NHWC"),
            precision=jax.lax.Precision.HIGHEST)
        x = jnp.maximum(x + b, 0.0)
    return jnp.mean(x, axis=(1, 2))   # avg_pool2d(4) on a 4x4 map -> (N, 10)


if __name__ == "__main__":
    key = jax.random.PRNGKey(0)
    pkey, xkey, xkey2 = jax.random.split(key, 3)
    params = init_params(pkey)
    prep = prepare_params(params)

    fwd = jax.jit(mnist_cnn_forward)

    # Small deterministic input consistent with x.view(-1, 1, 28, 28): batch=2.
    x = jax.random.normal(xkey, (2, 1, 28, 28), jnp.float32)
    out = jax.block_until_ready(fwd(x, prep))
    assert out.shape == (2, 10), out.shape
    ref = jax.block_until_ready(_reference_forward(x, params))
    np.testing.assert_allclose(np.asarray(out), np.asarray(ref),
                               rtol=5e-2, atol=5e-2)

    # Also exercise the multi-tile (grid > 1) + batch-padding path.
    xb = jax.random.normal(xkey2, (136, 1, 28, 28), jnp.float32)
    outb = jax.block_until_ready(fwd(xb, prep))
    refb = jax.block_until_ready(_reference_forward(xb, params))
    np.testing.assert_allclose(np.asarray(outb), np.asarray(refb),
                               rtol=5e-2, atol=5e-2)

    print("KERNEL_OK")
</pallas_src>

<mosaic_0001>
module attributes {stable_mosaic.version = 11 : i64} {
  func.func @_fused_mnist_kernel(%arg0: i32, %arg1: memref<112x84xbf16, #tpu.memory_space<vmem>>, %arg2: memref<84x224xbf16, #tpu.memory_space<vmem>>, %arg3: memref<1x224xf32, #tpu.memory_space<vmem>>, %arg4: memref<224x112xbf16, #tpu.memory_space<vmem>>, %arg5: memref<224x112xbf16, #tpu.memory_space<vmem>>, %arg6: memref<224x112xbf16, #tpu.memory_space<vmem>>, %arg7: memref<1x112xf32, #tpu.memory_space<vmem>>, %arg8: memref<112x64xbf16, #tpu.memory_space<vmem>>, %arg9: memref<112x64xbf16, #tpu.memory_space<vmem>>, %arg10: memref<112x64xbf16, #tpu.memory_space<vmem>>, %arg11: memref<1x64xf32, #tpu.memory_space<vmem>>, %arg12: memref<64x128xbf16, #tpu.memory_space<vmem>>, %arg13: memref<8x128xf32, #tpu.memory_space<vmem>>) attributes {dimension_semantics = [#tpu.dimension_semantics<parallel>], iteration_bounds = array<i64: 1>, scalar_prefetch = 0 : i64, scratch_operands = 0 : i64, tpu.core_type = #tpu.core_type<tc>, window_params = [{transform_indices = @transform_0, window_bounds = array<i64: 112, 84>}, {pipeline_mode = #tpu.pipeline_mode<synchronous>, transform_indices = @transform_1, window_bounds = array<i64: 84, 224>}, {pipeline_mode = #tpu.pipeline_mode<synchronous>, transform_indices = @transform_2, window_bounds = array<i64: 1, 224>}, {pipeline_mode = #tpu.pipeline_mode<synchronous>, transform_indices = @transform_3, window_bounds = array<i64: 224, 112>}, {pipeline_mode = #tpu.pipeline_mode<synchronous>, transform_indices = @transform_4, window_bounds = array<i64: 224, 112>}, {pipeline_mode = #tpu.pipeline_mode<synchronous>, transform_indices = @transform_5, window_bounds = array<i64: 224, 112>}, {pipeline_mode = #tpu.pipeline_mode<synchronous>, transform_indices = @transform_6, window_bounds = array<i64: 1, 112>}, {pipeline_mode = #tpu.pipeline_mode<synchronous>, transform_indices = @transform_7, window_bounds = array<i64: 112, 64>}, {pipeline_mode = #tpu.pipeline_mode<synchronous>, transform_indices = @transform_8, window_bounds = array<i64: 112, 64>}, {pipeline_mode = #tpu.pipeline_mode<synchronous>, transform_indices = @transform_9, window_bounds = array<i64: 112, 64>}, {pipeline_mode = #tpu.pipeline_mode<synchronous>, transform_indices = @transform_10, window_bounds = array<i64: 1, 64>}, {pipeline_mode = #tpu.pipeline_mode<synchronous>, transform_indices = @transform_11, window_bounds = array<i64: 64, 128>}, {transform_indices = @transform_12, window_bounds = array<i64: 8, 128>}]} {
    %c0 = arith.constant 0 : index
    %c0_0 = arith.constant 0 : index
    %0 = vector.load %arg1[%c0, %c0_0] : memref<112x84xbf16, #tpu.memory_space<vmem>>, vector<112x84xbf16>
    %c0_1 = arith.constant 0 : index
    %c0_2 = arith.constant 0 : index
    %1 = vector.load %arg2[%c0_1, %c0_2] : memref<84x224xbf16, #tpu.memory_space<vmem>>, vector<84x224xbf16>
    %cst = arith.constant dense<0.000000e+00> : vector<112x224xf32>
    %2 = tpu.matmul %0, %1, %cst {dimension_numbers = #tpu.dot_dimension_numbers<[1], [0], [0], [1], [0, 0, 1, 1], [], []>} : vector<112x84xbf16>, vector<84x224xbf16>, vector<112x224xf32> -> vector<112x224xf32>
    %c0_3 = arith.constant 0 : index
    %c0_4 = arith.constant 0 : index
    %3 = vector.load %arg3[%c0_3, %c0_4] : memref<1x224xf32, #tpu.memory_space<vmem>>, vector<1x224xf32>
    %4 = vector.broadcast %3 : vector<1x224xf32> to vector<112x224xf32>
    %5 = arith.addf %2, %4 : vector<112x224xf32>
    %cst_5 = arith.constant 0.000000e+00 : f32
    %6 = vector.broadcast %cst_5 : f32 to vector<112x224xf32>
    %7 = arith.maximumf %5, %6 : vector<112x224xf32>
    %8 = arith.truncf %7 : vector<112x224xf32> to vector<112x224xbf16>
    %c0_6 = arith.constant 0 : index
    %c0_7 = arith.constant 0 : index
    %9 = vector.load %arg4[%c0_6, %c0_7] : memref<224x112xbf16, #tpu.memory_space<vmem>>, vector<224x112xbf16>
    %c0_8 = arith.constant 0 : index
    %c0_9 = arith.constant 0 : index
    %10 = vector.load %arg5[%c0_8, %c0_9] : memref<224x112xbf16, #tpu.memory_space<vmem>>, vector<224x112xbf16>
    %c0_10 = arith.constant 0 : index
    %c0_11 = arith.constant 0 : index
    %11 = vector.load %arg6[%c0_10, %c0_11] : memref<224x112xbf16, #tpu.memory_space<vmem>>, vector<224x112xbf16>
    %cst_12 = arith.constant 0.000000e+00 : bf16
    %12 = vector.broadcast %cst_12 : bf16 to vector<8x224xbf16>
    %13 = vector.extract_strided_slice %8 {offsets = [8, 0], sizes = [8, 224], strides = [1, 1]} : vector<112x224xbf16> to vector<8x224xbf16>
    %14 = vector.extract_strided_slice %8 {offsets = [24, 0], sizes = [8, 224], strides = [1, 1]} : vector<112x224xbf16> to vector<8x224xbf16>
    %15 = vector.extract_strided_slice %8 {offsets = [40, 0], sizes = [8, 224], strides = [1, 1]} : vector<112x224xbf16> to vector<8x224xbf16>
    %16 = vector.extract_strided_slice %8 {offsets = [56, 0], sizes = [8, 224], strides = [1, 1]} : vector<112x224xbf16> to vector<8x224xbf16>
    %17 = vector.extract_strided_slice %8 {offsets = [72, 0], sizes = [8, 224], strides = [1, 1]} : vector<112x224xbf16> to vector<8x224xbf16>
    %18 = vector.extract_strided_slice %8 {offsets = [88, 0], sizes = [8, 224], strides = [1, 1]} : vector<112x224xbf16> to vector<8x224xbf16>
    %19 = tpu.concatenate %12, %13, %14, %15, %16, %17, %18 in 0 : vector<8x224xbf16>, vector<8x224xbf16>, vector<8x224xbf16>, vector<8x224xbf16>, vector<8x224xbf16>, vector<8x224xbf16>, vector<8x224xbf16> -> vector<56x224xbf16>
    %cst_13 = arith.constant dense<0.000000e+00> : vector<56x112xf32>
    %20 = tpu.matmul %19, %9, %cst_13 {dimension_numbers = #tpu.dot_dimension_numbers<[1], [0], [0], [1], [0, 0, 1, 1], [], []>} : vector<56x224xbf16>, vector<224x112xbf16>, vector<56x112xf32> -> vector<56x112xf32>
    %21 = vector.extract_strided_slice %8 {offsets = [0, 0], sizes = [8, 224], strides = [1, 1]} : vector<112x224xbf16> to vector<8x224xbf16>
    %22 = vector.extract_strided_slice %8 {offsets = [16, 0], sizes = [8, 224], strides = [1, 1]} : vector<112x224xbf16> to vector<8x224xbf16>
    %23 = vector.extract_strided_slice %8 {offsets = [32, 0], sizes = [8, 224], strides = [1, 1]} : vector<112x224xbf16> to vector<8x224xbf16>
    %24 = vector.extract_strided_slice %8 {offsets = [48, 0], sizes = [8, 224], strides = [1, 1]} : vector<112x224xbf16> to vector<8x224xbf16>
    %25 = vector.extract_strided_slice %8 {offsets = [64, 0], sizes = [8, 224], strides = [1, 1]} : vector<112x224xbf16> to vector<8x224xbf16>
    %26 = vector.extract_strided_slice %8 {offsets = [80, 0], sizes = [8, 224], strides = [1, 1]} : vector<112x224xbf16> to vector<8x224xbf16>
    %27 = vector.extract_strided_slice %8 {offsets = [96, 0], sizes = [8, 224], strides = [1, 1]} : vector<112x224xbf16> to vector<8x224xbf16>
    %28 = tpu.concatenate %21, %22, %23, %24, %25, %26, %27 in 0 : vector<8x224xbf16>, vector<8x224xbf16>, vector<8x224xbf16>, vector<8x224xbf16>, vector<8x224xbf16>, vector<8x224xbf16>, vector<8x224xbf16> -> vector<56x224xbf16>
    %cst_14 = arith.constant dense<0.000000e+00> : vector<56x112xf32>
    %29 = tpu.matmul %28, %10, %cst_14 {dimension_numbers = #tpu.dot_dimension_numbers<[1], [0], [0], [1], [0, 0, 1, 1], [], []>} : vector<56x224xbf16>, vector<224x112xbf16>, vector<56x112xf32> -> vector<56x112xf32>
    %30 = arith.addf %20, %29 : vector<56x112xf32>
    %31 = vector.extract_strided_slice %8 {offsets = [8, 0], sizes = [8, 224], strides = [1, 1]} : vector<112x224xbf16> to vector<8x224xbf16>
    %32 = vector.extract_strided_slice %8 {offsets = [24, 0], sizes = [8, 224], strides = [1, 1]} : vector<112x224xbf16> to vector<8x224xbf16>
    %33 = vector.extract_strided_slice %8 {offsets = [40, 0], sizes = [8, 224], strides = [1, 1]} : vector<112x224xbf16> to vector<8x224xbf16>
    %34 = vector.extract_strided_slice %8 {offsets = [56, 0], sizes = [8, 224], strides = [1, 1]} : vector<112x224xbf16> to vector<8x224xbf16>
    %35 = vector.extract_strided_slice %8 {offsets = [72, 0], sizes = [8, 224], strides = [1, 1]} : vector<112x224xbf16> to vector<8x224xbf16>
    %36 = vector.extract_strided_slice %8 {offsets = [88, 0], sizes = [8, 224], strides = [1, 1]} : vector<112x224xbf16> to vector<8x224xbf16>
    %37 = vector.extract_strided_slice %8 {offsets = [104, 0], sizes = [8, 224], strides = [1, 1]} : vector<112x224xbf16> to vector<8x224xbf16>
    %38 = tpu.concatenate %31, %32, %33, %34, %35, %36, %37 in 0 : vector<8x224xbf16>, vector<8x224xbf16>, vector<8x224xbf16>, vector<8x224xbf16>, vector<8x224xbf16>, vector<8x224xbf16>, vector<8x224xbf16> -> vector<56x224xbf16>
    %cst_15 = arith.constant dense<0.000000e+00> : vector<56x112xf32>
    %39 = tpu.matmul %38, %11, %cst_15 {dimension_numbers = #tpu.dot_dimension_numbers<[1], [0], [0], [1], [0, 0, 1, 1], [], []>} : vector<56x224xbf16>, vector<224x112xbf16>, vector<56x112xf32> -> vector<56x112xf32>
    %40 = arith.addf %30, %39 : vector<56x112xf32>
    %c0_16 = arith.constant 0 : index
    %c0_17 = arith.constant 0 : index
    %41 = vector.load %arg7[%c0_16, %c0_17] : memref<1x112xf32, #tpu.memory_space<vmem>>, vector<1x112xf32>
    %42 = vector.broadcast %41 : vector<1x112xf32> to vector<56x112xf32>
    %43 = arith.addf %40, %42 : vector<56x112xf32>
    %cst_18 = arith.constant 0.000000e+00 : f32
    %44 = vector.broadcast %cst_18 : f32 to vector<56x112xf32>
    %45 = arith.maximumf %43, %44 : vector<56x112xf32>
    %46 = arith.truncf %45 : vector<56x112xf32> to vector<56x112xbf16>
    %c0_19 = arith.constant 0 : index
    %c0_20 = arith.constant 0 : index
    %47 = vector.load %arg8[%c0_19, %c0_20] : memref<112x64xbf16, #tpu.memory_space<vmem>>, vector<112x64xbf16>
    %c0_21 = arith.constant 0 : index
    %c0_22 = arith.constant 0 : index
    %48 = vector.load %arg9[%c0_21, %c0_22] : memref<112x64xbf16, #tpu.memory_space<vmem>>, vector<112x64xbf16>
    %c0_23 = arith.constant 0 : index
    %c0_24 = arith.constant 0 : index
    %49 = vector.load %arg10[%c0_23, %c0_24] : memref<112x64xbf16, #tpu.memory_space<vmem>>, vector<112x64xbf16>
    %cst_25 = arith.constant 0.000000e+00 : bf16
    %50 = vector.broadcast %cst_25 : bf16 to vector<8x112xbf16>
    %51 = vector.extract_strided_slice %46 {offsets = [8, 0], sizes = [8, 112], strides = [1, 1]} : vector<56x112xbf16> to vector<8x112xbf16>
    %52 = vector.extract_strided_slice %46 {offsets = [24, 0], sizes = [8, 112], strides = [1, 1]} : vector<56x112xbf16> to vector<8x112xbf16>
    %53 = vector.extract_strided_slice %46 {offsets = [40, 0], sizes = [8, 112], strides = [1, 1]} : vector<56x112xbf16> to vector<8x112xbf16>
    %54 = tpu.concatenate %50, %51, %52, %53 in 0 : vector<8x112xbf16>, vector<8x112xbf16>, vector<8x112xbf16>, vector<8x112xbf16> -> vector<32x112xbf16>
    %cst_26 = arith.constant dense<0.000000e+00> : vector<32x64xf32>
    %55 = tpu.matmul %54, %47, %cst_26 {dimension_numbers = #tpu.dot_dimension_numbers<[1], [0], [0], [1], [0, 0, 1, 1], [], []>} : vector<32x112xbf16>, vector<112x64xbf16>, vector<32x64xf32> -> vector<32x64xf32>
    %56 = vector.extract_strided_slice %46 {offsets = [0, 0], sizes = [8, 112], strides = [1, 1]} : vector<56x112xbf16> to vector<8x112xbf16>
    %57 = vector.extract_strided_slice %46 {offsets = [16, 0], sizes = [8, 112], strides = [1, 1]} : vector<56x112xbf16> to vector<8x112xbf16>
    %58 = vector.extract_strided_slice %46 {offsets = [32, 0], sizes = [8, 112], strides = [1, 1]} : vector<56x112xbf16> to vector<8x112xbf16>
    %59 = vector.extract_strided_slice %46 {offsets = [48, 0], sizes = [8, 112], strides = [1, 1]} : vector<56x112xbf16> to vector<8x112xbf16>
    %60 = tpu.concatenate %56, %57, %58, %59 in 0 : vector<8x112xbf16>, vector<8x112xbf16>, vector<8x112xbf16>, vector<8x112xbf16> -> vector<32x112xbf16>
    %cst_27 = arith.constant dense<0.000000e+00> : vector<32x64xf32>
    %61 = tpu.matmul %60, %48, %cst_27 {dimension_numbers = #tpu.dot_dimension_numbers<[1], [0], [0], [1], [0, 0, 1, 1], [], []>} : vector<32x112xbf16>, vector<112x64xbf16>, vector<32x64xf32> -> vector<32x64xf32>
    %62 = arith.addf %55, %61 : vector<32x64xf32>
    %63 = vector.extract_strided_slice %46 {offsets = [8, 0], sizes = [8, 112], strides = [1, 1]} : vector<56x112xbf16> to vector<8x112xbf16>
    %64 = vector.extract_strided_slice %46 {offsets = [24, 0], sizes = [8, 112], strides = [1, 1]} : vector<56x112xbf16> to vector<8x112xbf16>
    %65 = vector.extract_strided_slice %46 {offsets = [40, 0], sizes = [8, 112], strides = [1, 1]} : vector<56x112xbf16> to vector<8x112xbf16>
    %cst_28 = arith.constant 0.000000e+00 : bf16
    %66 = vector.broadcast %cst_28 : bf16 to vector<8x112xbf16>
    %67 = tpu.concatenate %63, %64, %65, %66 in 0 : vector<8x112xbf16>, vector<8x112xbf16>, vector<8x112xbf16>, vector<8x112xbf16> -> vector<32x112xbf16>
    %cst_29 = arith.constant dense<0.000000e+00> : vector<32x64xf32>
    %68 = tpu.matmul %67, %49, %cst_29 {dimension_numbers = #tpu.dot_dimension_numbers<[1], [0], [0], [1], [0, 0, 1, 1], [], []>} : vector<32x112xbf16>, vector<112x64xbf16>, vector<32x64xf32> -> vector<32x64xf32>
    %69 = arith.addf %62, %68 : vector<32x64xf32>
    %c0_30 = arith.constant 0 : index
    %c0_31 = arith.constant 0 : index
    %70 = vector.load %arg11[%c0_30, %c0_31] : memref<1x64xf32, #tpu.memory_space<vmem>>, vector<1x64xf32>
    %71 = vector.broadcast %70 : vector<1x64xf32> to vector<32x64xf32>
    %72 = arith.addf %69, %71 : vector<32x64xf32>
    %cst_32 = arith.constant 0.000000e+00 : f32
    %73 = vector.broadcast %cst_32 : f32 to vector<32x64xf32>
    %74 = arith.maximumf %72, %73 : vector<32x64xf32>
    %75 = vector.extract_strided_slice %74 {offsets = [0, 0], sizes = [8, 64], strides = [1, 1]} : vector<32x64xf32> to vector<8x64xf32>
    %76 = vector.extract_strided_slice %74 {offsets = [8, 0], sizes = [8, 64], strides = [1, 1]} : vector<32x64xf32> to vector<8x64xf32>
    %77 = arith.addf %75, %76 : vector<8x64xf32>
    %78 = vector.extract_strided_slice %74 {offsets = [16, 0], sizes = [8, 64], strides = [1, 1]} : vector<32x64xf32> to vector<8x64xf32>
    %79 = arith.addf %77, %78 : vector<8x64xf32>
    %80 = vector.extract_strided_slice %74 {offsets = [24, 0], sizes = [8, 64], strides = [1, 1]} : vector<32x64xf32> to vector<8x64xf32>
    %81 = arith.addf %79, %80 : vector<8x64xf32>
    %82 = arith.truncf %81 : vector<8x64xf32> to vector<8x64xbf16>
    %c0_33 = arith.constant 0 : index
    %c0_34 = arith.constant 0 : index
    %83 = vector.load %arg12[%c0_33, %c0_34] : memref<64x128xbf16, #tpu.memory_space<vmem>>, vector<64x128xbf16>
    %cst_35 = arith.constant dense<0.000000e+00> : vector<8x128xf32>
    %84 = tpu.matmul %82, %83, %cst_35 {dimension_numbers = #tpu.dot_dimension_numbers<[1], [0], [0], [1], [0, 0, 1, 1], [], []>} : vector<8x64xbf16>, vector<64x128xbf16>, vector<8x128xf32> -> vector<8x128xf32>
    %c0_36 = arith.constant 0 : index
    %c0_37 = arith.constant 0 : index
    %85 = vector.load %arg13[%c0_36, %c0_37] : memref<8x128xf32, #tpu.memory_space<vmem>>, vector<8x128xf32>
    tpu.vector_store %arg13[%c0_36, %c0_37], %84 {strides = array<i32>} : memref<8x128xf32, #tpu.memory_space<vmem>>, vector<8x128xf32>,
    return
  }
  func.func @transform_0(%arg0: i32) -> (i32, i32) {
    %c0_i32 = arith.constant 0 : i32
    %c0_i32_0 = arith.constant 0 : i32
    return %arg0, %c0_i32 : i32, i32
  }
  func.func @transform_1(%arg0: i32) -> (i32, i32) {
    %c0_i32 = arith.constant 0 : i32
    %c0_i32_0 = arith.constant 0 : i32
    %c0_i32_1 = arith.constant 0 : i32
    return %c0_i32, %c0_i32_0 : i32, i32
  }
  func.func @transform_2(%arg0: i32) -> (i32, i32) {
    %c0_i32 = arith.constant 0 : i32
    %c0_i32_0 = arith.constant 0 : i32
    %c0_i32_1 = arith.constant 0 : i32
    return %c0_i32, %c0_i32_0 : i32, i32
  }
  func.func @transform_3(%arg0: i32) -> (i32, i32) {
    %c0_i32 = arith.constant 0 : i32
    %c0_i32_0 = arith.constant 0 : i32
    %c0_i32_1 = arith.constant 0 : i32
    return %c0_i32, %c0_i32_0 : i32, i32
  }
  func.func @transform_4(%arg0: i32) -> (i32, i32) {
    %c0_i32 = arith.constant 0 : i32
    %c0_i32_0 = arith.constant 0 : i32
    %c0_i32_1 = arith.constant 0 : i32
    return %c0_i32, %c0_i32_0 : i32, i32
  }
  func.func @transform_5(%arg0: i32) -> (i32, i32) {
    %c0_i32 = arith.constant 0 : i32
    %c0_i32_0 = arith.constant 0 : i32
    %c0_i32_1 = arith.constant 0 : i32
    return %c0_i32, %c0_i32_0 : i32, i32
  }
  func.func @transform_6(%arg0: i32) -> (i32, i32) {
    %c0_i32 = arith.constant 0 : i32
    %c0_i32_0 = arith.constant 0 : i32
    %c0_i32_1 = arith.constant 0 : i32
    return %c0_i32, %c0_i32_0 : i32, i32
  }
  func.func @transform_7(%arg0: i32) -> (i32, i32) {
    %c0_i32 = arith.constant 0 : i32
    %c0_i32_0 = arith.constant 0 : i32
    %c0_i32_1 = arith.constant 0 : i32
    return %c0_i32, %c0_i32_0 : i32, i32
  }
  func.func @transform_8(%arg0: i32) -> (i32, i32) {
    %c0_i32 = arith.constant 0 : i32
    %c0_i32_0 = arith.constant 0 : i32
    %c0_i32_1 = arith.constant 0 : i32
    return %c0_i32, %c0_i32_0 : i32, i32
  }
  func.func @transform_9(%arg0: i32) -> (i32, i32) {
    %c0_i32 = arith.constant 0 : i32
    %c0_i32_0 = arith.constant 0 : i32
    %c0_i32_1 = arith.constant 0 : i32
    return %c0_i32, %c0_i32_0 : i32, i32
  }
  func.func @transform_10(%arg0: i32) -> (i32, i32) {
    %c0_i32 = arith.constant 0 : i32
    %c0_i32_0 = arith.constant 0 : i32
    %c0_i32_1 = arith.constant 0 : i32
    return %c0_i32, %c0_i32_0 : i32, i32
  }
  func.func @transform_11(%arg0: i32) -> (i32, i32) {
    %c0_i32 = arith.constant 0 : i32
    %c0_i32_0 = arith.constant 0 : i32
    %c0_i32_1 = arith.constant 0 : i32
    return %c0_i32, %c0_i32_0 : i32, i32
  }
  func.func @transform_12(%arg0: i32) -> (i32, i32) {
    %c0_i32 = arith.constant 0 : i32
    %c0_i32_0 = arith.constant 0 : i32
    return %arg0, %c0_i32 : i32, i32
  }
}

</mosaic_0001>

<bundles_post_ra>
// kernel: mnist_cnn_forward.1
= control target key start
LH: loop header
LB: loop body
LE: loop exit
PB: predicated region body
PF: predicated region fallthrough
CT: control target
= control target key end

     0   :  { %v1783_v1 = vmov 0   ;;  %vm191_vm0 = vcmask 1041408   ;;  %vm169_vm1 = vcmask 687104   ;;  %v69_v50 = vlaneseq  ;;  %s2264_s1 = inlined_call_operand.vmem [shape: bf16[84,224], index: 1, kind: input, shape index: {}]   ;;  %s2265_s0 = inlined_call_operand.vmem [shape: bf16[112,84], index: 0, kind: input, shape index: {}]   ;;  %s2266_s3 = inlined_call_operand.vmem [shape: bf16[224,112], index: 3, kind: input, shape index: {}]   ;;  %s2267_s4 = inlined_call_operand.vmem [shape: bf16[224,112], index: 4, kind: input, shape index: {}]   ;;  %s2268_s5 = inlined_call_operand.vmem [shape: bf16[224,112], index: 5, kind: input, shape index: {}]   ;;  %s2269_s2 = inlined_call_operand.vmem [shape: f32[1,224], index: 2, kind: input, shape index: {}]   ;;  %s2270_s7 = inlined_call_operand.vmem [shape: bf16[112,64], index: 7, kind: input, shape index: {}]   ;;  %s2271_s8 = inlined_call_operand.vmem [shape: bf16[112,64], index: 8, kind: input, shape index: {}]   ;;  %s2272_s9 = inlined_call_operand.vmem [shape: bf16[112,64], index: 9, kind: input, shape index: {}]   ;;  %s2273_s6 = inlined_call_operand.vmem [shape: f32[1,112], index: 6, kind: input, shape index: {}]   ;;  %s2274_s11 = inlined_call_operand.vmem [shape: bf16[64,128], index: 11, kind: input, shape index: {}]   ;;  %s2275_s10 = inlined_call_operand.vmem [shape: f32[1,64], index: 10, kind: input, shape index: {}]   ;;  %s2276_s12 = inlined_call_operand.vmem [shape: f32[8,128], index: 12, kind: output, shape index: {}]  }
   0x1   :  { %v1692_v0 = vld [vmem:[%s2264_s1 + $0x4] ss:$8 sps:$4 sm:$0xff]   ;;  %230 = vmatprep.mubr.bf16.mxu0 %v1783_v1  ;;  %566 = vmatprep.subr.bf16.mxu1 %v1783_v1  ;;  %v1694_v2 = vld [vmem:[%s2264_s1] ss:$8 sps:$4 sm:$0xff]   ;;  %v1695_v3 = vld [vmem:[%s2264_s1 + $0x14] ss:$8 sps:$4 sm:$0xff]  }
   0x2   :  { %198 = vmatprep.subr.bf16.mxu0 %v1692_v0  ;;  %v1697_v4 = vld [vmem:[%s2264_s1 + $0x10] ss:$8 sps:$4 sm:$0xff]   ;;  %v1698_v5 = vld [vmem:[%s2264_s1 + $0x24] ss:$8 sps:$4 sm:$0xff]   ;;  %v1700_v6 = vld [vmem:[%s2264_s1 + $0x20] ss:$8 sps:$4 sm:$0xff]  }
   0x3   :  { %199 = vmatpush1.bf16.msra.mxu0 %v1694_v2  ;;  %v1701_v7 = vld [vmem:[%s2264_s1 + $0x34] ss:$8 sps:$4 sm:$0xff]   ;;  %v1703_v8 = vld [vmem:[%s2264_s1 + $0x30] ss:$8 sps:$4 sm:$0xff]   ;;  %v1704_v9 = vld [vmem:[%s2264_s1 + $0x44] ss:$8 sps:$4 sm:$0xff]  }
   0x4   :  { %200 = vmatprep.subr.bf16.mxu0 %v1695_v3  ;;  %v66_v10 = vld [vmem:[%s2264_s1 + $0x50] sm:$0x33]  ;;  %v1706_v11 = vld [vmem:[%s2264_s1 + $0x40] ss:$8 sps:$4 sm:$0xff]   ;;  %v1725_v21 = vld [vmem:[%s2267_s4 + $0x18] sm:$0xff]   ;;  %v70_v51 = vshrl.u32 %v69_v50, 7 }
   0x5   :  { %v1484_v12 = vcombine.high %v66_v10, %v66_v10  ;;  %v1483_v13 = vcombine.low %v66_v10, %v66_v10  ;;  %v1719_v14 = vld [vmem:[%s2267_s4] sm:$0xff]   ;;  %v1721_v15 = vld [vmem:[%s2267_s4 + $0x8] sm:$0xff]   ;;  %v1723_v19 = vld [vmem:[%s2267_s4 + $0x10] sm:$0xff]   ;;  %vm440_vm2 = vcmask 1043456   ;;  %vm556_vm3 = vcmask 785408  }
   0x6   :  { %567 = vmatpush1.bf16.msra.mxu1 %v1719_v14  ;;  %v1709_v17 = vld [vmem:[%s2265_s0] sm:$0xff]   ;;  %v1717_v20 = vld [vmem:[%s2266_s3 + $0x8] sm:$0xff]   ;;  %v1718_v23 = vld [vmem:[%s2266_s3 + $0x10] sm:$0xff]   ;;  %v71_v52 = vsub.s32 0, %v70_v51  ;;  %v75_v54 = vsub.s32 1, %v70_v51  ;;  %vm1109_vm5 = vcmask 916480  }
   0x7   :  { %201 = vmatpush1.bf16.msra.mxu0 %v1697_v4  ;;  %v193_v16 = vsel %vm191_vm0, %v1483_v13, 0  ;;  %568 = vmatprep.subr.bf16.mxu1 %v1783_v1  ;;  %v1716_v18 = vld [vmem:[%s2266_s3] sm:$0xff]   ;;  %v1710_v22 = vld [vmem:[%s2265_s0 + $0x8] sm:$0xff]   ;;  %v1720_v25 = vld [vmem:[%s2266_s3 + $0x18] sm:$0xff]   ;;  %vm1785_vm6 = vmmov 0   ;;  %vm1417_vm7 = vcmask 523264  }
   0x8   :  { %202 = vmatprep.subr.bf16.mxu0 %v1698_v5  ;;  %v1727_v24 = vld [vmem:[%s2267_s4 + $0x20] sm:$0xff]   ;;  %v1729_v26 = vld [vmem:[%s2267_s4 + $0x28] sm:$0xff]   ;;  %v1711_v27 = vld [vmem:[%s2265_s0 + $0x10] sm:$0xff]  }
   0x9   :  { %v1722_v28 = vld [vmem:[%s2266_s3 + $0x20] sm:$0xff]   ;;  %v1731_v29 = vld [vmem:[%s2267_s4 + $0x30] sm:$0xff]   ;;  %v1724_v30 = vld [vmem:[%s2266_s3 + $0x28] sm:$0xff]  }
   0xa   :  { %569 = vmatpush1.bf16.msra.mxu1 %v1721_v15  ;;  %v1733_v31 = vld [vmem:[%s2267_s4 + $0x38] sm:$0xff]   ;;  %v1726_v33 = vld [vmem:[%s2266_s3 + $0x30] sm:$0xff]   ;;  %v1735_v34 = vld [vmem:[%s2267_s4 + $0x40] sm:$0xff]  }
   0xb   :  { %203 = vmatpush1.bf16.msra.mxu0 %v1700_v6  ;;  %570 = vmatprep.subr.bf16.mxu1 %v1783_v1  ;;  %v1712_v32 = vld [vmem:[%s2265_s0 + $0x18] sm:$0xff]   ;;  %v1713_v36 = vld [vmem:[%s2265_s0 + $0x20] sm:$0xff]   ;;  %v1732_v38 = vld [vmem:[%s2266_s3 + $0x48] sm:$0xff]  }
   0xc   :  { %204 = vmatprep.subr.bf16.mxu0 %v1701_v7  ;;  %v1728_v35 = vld [vmem:[%s2266_s3 + $0x38] sm:$0xff]   ;;  %v1730_v37 = vld [vmem:[%s2266_s3 + $0x40] sm:$0xff]   ;;  %v1714_v39 = vld [vmem:[%s2265_s0 + $0x28] sm:$0xff]  }
   0xd   :  { %v1734_v40 = vld [vmem:[%s2266_s3 + $0x50] sm:$0xff]   ;;  %v1736_v42 = vld [vmem:[%s2266_s3 + $0x58] sm:$0xff]   ;;  %v1737_v43 = vld [vmem:[%s2267_s4 + $0x48] sm:$0xff]  }
   0xe   :  { %571 = vmatpush1.bf16.msra.mxu1 %v1723_v19  ;;  %v1715_v41 = vld [vmem:[%s2265_s0 + $0x30] sm:$0xff]   ;;  %v1738_v44 = vld [vmem:[%s2266_s3 + $0x60] sm:$0xff]   ;;  %v1740_v46 = vld [vmem:[%s2266_s3 + $0x68] sm:$0xff]  }
   0xf   :  { %205 = vmatpush1.bf16.msra.mxu0 %v1703_v8  ;;  %572 = vmatprep.subr.bf16.mxu1 %v1783_v1  ;;  %v1739_v45 = vld [vmem:[%s2267_s4 + $0x50] sm:$0xff]   ;;  %v1741_v47 = vld [vmem:[%s2267_s4 + $0x58] sm:$0xff]   ;;  %v1742_v48 = vld [vmem:[%s2267_s4 + $0x60] sm:$0xff]  }
  0x10   :  { %206 = vmatprep.subr.bf16.mxu0 %v1704_v9  ;;  %v1743_v49 = vld [vmem:[%s2267_s4 + $0x68] sm:$0xff]   ;;  %v67_v53 = vld [vmem:[%s2269_s2] sm:$0x3]  ;;  %vm1526_vm4 = vmneg %vm440_vm2 }
  0x11   :  { %v2035_v55 = vrot.slane %v67_v53, %v71_v52  ;;  %v2037_v56 = vrot.slane %v67_v53, %v75_v54 }
  0x12   :  { %573 = vmatpush1.bf16.msra.mxu1 %v1725_v21 }
  0x13   :  { %207 = vmatpush1.bf16.msra.mxu0 %v1706_v11  ;;  %574 = vmatprep.subr.bf16.mxu1 %v1783_v1 }
  0x14   :  { %1485 = vmatprep.subr.msk.bf16.mxu0 %vm191_vm0, %v1484_v12 }
  0x16   :  { %575 = vmatpush1.bf16.msra.mxu1 %v1727_v24 }
  0x17   :  { %209 = vmatpush1.bf16.msra.mxu0 %v193_v16  ;;  %576 = vmatprep.subr.bf16.mxu1 %v1783_v1 }
  0x18   :  { %722 = vmatprep.subr.bf16.mxu0 %v1783_v1 }
  0x1a   :  { %1486 = vmatmul.mubr.msk.bf16.vlgmr.msra.gmra.mrb[0].mxu0 %vm169_vm1, %v1709_v17  ;;  %577 = vmatpush1.bf16.msra.mxu1 %v1729_v26 }
  0x1b   :  { %240 = vmatprep.mubr.bf16.mxu0 %v1783_v1  ;;  %723 = vmatpush1.bf16.msra.mxu0 %v1716_v18 }
  0x1c   :  { %724 = vmatprep.subr.bf16.mxu0 %v1783_v1  ;;  %578 = vmatprep.subr.bf16.mxu1 %v1783_v1 }
  0x1e   :  { %579 = vmatpush1.bf16.msra.mxu1 %v1731_v29 }
  0x1f   :  { %725 = vmatpush1.bf16.msra.mxu0 %v1717_v20  ;;  %580 = vmatprep.subr.bf16.mxu1 %v1783_v1 }
  0x20   :  { %726 = vmatprep.subr.bf16.mxu0 %v1783_v1 }
  0x22   :  { %1487 = vmatmul.mubr.msk.bf16.gmra.mrb[4].mxu0 %vm169_vm1, %v1710_v22  ;;  %581 = vmatpush1.bf16.msra.mxu1 %v1733_v31 }
  0x23   :  { %250 = vmatprep.mubr.bf16.mxu0 %v1783_v1  ;;  %727 = vmatpush1.bf16.msra.mxu0 %v1718_v23 }
  0x24   :  { %728 = vmatprep.subr.bf16.mxu0 %v1783_v1  ;;  %582 = vmatprep.subr.bf16.mxu1 %v1783_v1 }
  0x26   :  { %583 = vmatpush1.bf16.msra.mxu1 %v1735_v34 }
  0x27   :  { %729 = vmatpush1.bf16.msra.mxu0 %v1720_v25  ;;  %584 = vmatprep.subr.bf16.mxu1 %v1783_v1 }
  0x28   :  { %730 = vmatprep.subr.bf16.mxu0 %v1783_v1 }
  0x2a   :  { %1488 = vmatmul.mubr.msk.bf16.gmra.mrb[8].mxu0 %vm169_vm1, %v1711_v27  ;;  %585 = vmatpush1.bf16.msra.mxu1 %v1737_v43 }
  0x2b   :  { %260 = vmatprep.mubr.bf16.mxu0 %v1783_v1  ;;  %731 = vmatpush1.bf16.msra.mxu0 %v1722_v28 }
  0x2c   :  { %732 = vmatprep.subr.bf16.mxu0 %v1783_v1  ;;  %586 = vmatprep.subr.bf16.mxu1 %v1783_v1 }
  0x2e   :  { %587 = vmatpush1.bf16.msra.mxu1 %v1739_v45  ;;  %v1745_v45 = vld [vmem:[%s2268_s5 + $0x8] sm:$0xff]  }
  0x2f   :  { %733 = vmatpush1.bf16.msra.mxu0 %v1724_v30  ;;  %588 = vmatprep.subr.bf16.mxu1 %v1783_v1 }
  0x30   :  { %734 = vmatprep.subr.bf16.mxu0 %v1783_v1 }
  0x32   :  { %1489 = vmatmul.mubr.msk.bf16.gmra.mrb[12].mxu0 %vm169_vm1, %v1712_v32  ;;  %589 = vmatpush1.bf16.msra.mxu1 %v1741_v47 }
  0x33   :  { %270 = vmatprep.mubr.bf16.mxu0 %v1783_v1  ;;  %735 = vmatpush1.bf16.msra.mxu0 %v1726_v33 }
  0x34   :  { %736 = vmatprep.subr.bf16.mxu0 %v1783_v1  ;;  %590 = vmatprep.subr.bf16.mxu1 %v1783_v1 }
  0x36   :  { %591 = vmatpush1.bf16.msra.mxu1 %v1742_v48 }
  0x37   :  { %737 = vmatpush1.bf16.msra.mxu0 %v1728_v35  ;;  %592 = vmatprep.subr.bf16.mxu1 %v1783_v1 }
  0x38   :  { %738 = vmatprep.subr.bf16.mxu0 %v1783_v1 }
  0x3a   :  { %1490 = vmatmul.mubr.msk.bf16.gmra.mrb[16].mxu0 %vm169_vm1, %v1713_v36  ;;  %593 = vmatpush1.bf16.msra.mxu1 %v1743_v49 }
  0x3b   :  { %280 = vmatprep.mubr.bf16.mxu0 %v1783_v1  ;;  %739 = vmatpush1.bf16.msra.mxu0 %v1730_v37 }
  0x3c   :  { %740 = vmatprep.subr.bf16.mxu0 %v1783_v1  ;;  %917 = vmatprep.subr.bf16.mxu1 %v1783_v1 }
  0x3f   :  { %741 = vmatpush1.bf16.msra.mxu0 %v1732_v38  ;;  %v1744_v38 = vld [vmem:[%s2268_s5] sm:$0xff]  }
  0x40   :  { %742 = vmatprep.subr.bf16.mxu0 %v1783_v1 }
  0x42   :  { %1491 = vmatmul.mubr.msk.bf16.gmra.mrb[20].mxu0 %vm169_vm1, %v1714_v39 }
  0x43   :  { %290 = vmatprep.mubr.bf16.mxu0 %v1783_v1  ;;  %743 = vmatpush1.bf16.msra.mxu0 %v1734_v40 }
  0x44   :  { %744 = vmatprep.subr.bf16.mxu0 %v1783_v1 }
  0x47   :  { %745 = vmatpush1.bf16.msra.mxu0 %v1736_v42 }
  0x48   :  { %746 = vmatprep.subr.bf16.mxu0 %v1783_v1 }
  0x4a   :  { %1492 = vmatmul.mubr.msk.bf16.gmra.mrb[24].mxu0 %vm169_vm1, %v1715_v41 }
  0x4b   :  { %747 = vmatpush1.bf16.msra.mxu0 %v1738_v44 }
  0x4c   :  { %748 = vmatprep.subr.bf16.mxu0 %v1783_v1 }
  0x4f   :  { %749 = vmatpush1.bf16.msra.mxu0 %v1740_v46 }
  0xed   :  { %v232_v57 = vpop.f32.mrb[0].mxu0 }
  0xee   :  { %v233_v58 = vadd.f32 %v232_v57, %v2035_v55  ;;  %v234_v59 = vpop.f32.mrb[1].mxu0 }
  0xef   :  { %v235_v60 = vadd.f32 %v234_v59, %v2037_v56  ;;  %v236_v61 = vpop.f32.mrb[2].mxu0  ;;  %v1746_v59 = vld [vmem:[%s2268_s5 + $0x10] sm:$0xff]  }
  0xf0   :  { %v237_v62 = vadd.f32 %v236_v61, %v2035_v55  ;;  %v238_v63 = vpop.f32.mrb[3].mxu0  ;;  %v301_v2 = vmax.f32 %v233_v58, 0.0 }
  0xf1   :  { %v239_v0 = vadd.f32 %v238_v63, %v2037_v56  ;;  %v302_v4 = vmax.f32 %v235_v60, 0.0 }
  0xf2   :  { %v303_v3 = vmax.f32 %v237_v62, 0.0 }
  0xf3   :  { %v304_v5 = vmax.f32 %v239_v0, 0.0 }
  0xf4   :  { %v329_v6 = vpack.c.bf16 %v303_v3, %v301_v2  ;;  %v1747_v3 = vld [vmem:[%s2268_s5 + $0x18] sm:$0xff]  }
  0xf5   :  { %v330_v7 = vpack.c.bf16 %v304_v5, %v302_v4  ;;  %v242_v8 = vpop.f32.mrb[4].mxu0 }
  0xf6   :  { %v243_v9 = vadd.f32 %v242_v8, %v2035_v55  ;;  %v244_v10 = vpop.f32.mrb[5].mxu0  ;;  %v788_v21 = vrot.slane %v329_v6, 4 }
  0xf7   :  { %v245_v11 = vadd.f32 %v244_v10, %v2037_v56  ;;  %v246_v12 = vpop.f32.mrb[6].mxu0  ;;  %v446_v13 = vsel %vm440_vm2, 0, %v330_v7  ;;  %v789_v23 = vrot.slane %v330_v7, 4 }
  0xf8   :  { %v247_v14 = vadd.f32 %v246_v12, %v2035_v55  ;;  %v248_v15 = vpop.f32.mrb[7].mxu0  ;;  %1525 = vmatprep.mubr.msk.bf16.mxu0 %vm556_vm3, %v446_v13  ;;  %v305_v17 = vmax.f32 %v243_v9, 0.0 }
  0xf9   :  { %v249_v16 = vadd.f32 %v248_v15, %v2037_v56  ;;  %1527 = vmatmul.mubr.msk.bf16.vlgmr.msra.gmra.mrb[28].mxu0 %vm1526_vm4, %v329_v6  ;;  %v306_v19 = vmax.f32 %v245_v11, 0.0 }
  0xfa   :  { %v307_v18 = vmax.f32 %v247_v14, 0.0 }
  0xfb   :  { %v308_v20 = vmax.f32 %v249_v16, 0.0 }
  0xfc   :  { %v331_v22 = vpack.c.bf16 %v307_v18, %v305_v17 }
  0xfd   :  { %v332_v24 = vpack.c.bf16 %v308_v20, %v306_v19  ;;  %v252_v25 = vpop.f32.mrb[8].mxu0  ;;  %v1748_v19 = vld [vmem:[%s2268_s5 + $0x20] sm:$0xff]  }
  0xfe   :  { %v429_v26 = vrot.slane %v331_v22, 4  ;;  %v253_v27 = vadd.f32 %v252_v25, %v2035_v55  ;;  %v254_v28 = vpop.f32.mrb[9].mxu0  ;;  %v2052_v29 = vsel %vm440_vm2, %v788_v21, %v331_v22 }
  0xff   :  { %v255_v30 = vadd.f32 %v254_v28, %v2037_v56  ;;  %v256_v31 = vpop.f32.mrb[10].mxu0  ;;  %v430_v32 = vrot.slane %v332_v24, 4  ;;  %v2056_v33 = vsel %vm440_vm2, %v789_v23, %v332_v24 }
 0x100   :  { %v309_v34 = vmax.f32 %v253_v27, 0.0  ;;  %v257_v35 = vadd.f32 %v256_v31, %v2035_v55  ;;  %v258_v36 = vpop.f32.mrb[11].mxu0  ;;  %v461_v37 = vsel %vm440_vm2, %v329_v6, %v429_v26 }
 0x101   :  { %v310_v39 = vmax.f32 %v255_v30, 0.0  ;;  %v259_v40 = vadd.f32 %v258_v36, %v2037_v56  ;;  %v463_v41 = vsel %vm440_vm2, %v330_v7, %v430_v32 }
 0x102   :  { %v311_v42 = vmax.f32 %v257_v35, 0.0  ;;  %1507 = vmatprep.mubr.msk.bf16.mxu1 %vm556_vm3, %v463_v41 }
 0x103   :  { %v312_v43 = vmax.f32 %v259_v40, 0.0  ;;  %599 = vmatmul.mubr.bf16.vlgmr.msra.gmra.mrb[0].mxu1 %v461_v37  ;;  %v1750_v40 = vld [vmem:[%s2268_s5 + $0x30] sm:$0xff]  }
 0x104   :  { %v333_v44 = vpack.c.bf16 %v311_v42, %v309_v34  ;;  %918 = vmatpush1.bf16.msra.mxu1 %v1744_v38 }
 0x105   :  { %v334_v46 = vpack.c.bf16 %v312_v43, %v310_v39  ;;  %v262_v47 = vpop.f32.mrb[12].mxu0  ;;  %919 = vmatprep.subr.bf16.mxu1 %v1783_v1 }
 0x106   :  { %v263_v48 = vadd.f32 %v262_v47, %v2035_v55  ;;  %v264_v49 = vpop.f32.mrb[13].mxu0  ;;  %v449_v50 = vsel %vm440_vm2, %v429_v26, %v333_v44  ;;  %v792_v63 = vrot.slane %v333_v44, 4  ;;  %v1749_v26 = vld [vmem:[%s2268_s5 + $0x28] sm:$0xff]   ;;  %v1751_v47 = vld [vmem:[%s2268_s5 + $0x38] sm:$0xff]  }
 0x107   :  { %v265_v51 = vadd.f32 %v264_v49, %v2037_v56  ;;  %v266_v52 = vpop.f32.mrb[14].mxu0  ;;  %v453_v53 = vsel %vm440_vm2, %v430_v32, %v334_v46  ;;  %v793_v4 = vrot.slane %v334_v46, 4 }
 0x108   :  { %v313_v54 = vmax.f32 %v263_v48, 0.0  ;;  %v267_v57 = vadd.f32 %v266_v52, %v2035_v55  ;;  %920 = vmatpush1.bf16.msra.mxu1 %v1745_v45  ;;  %v268_v58 = vpop.f32.mrb[15].mxu0  ;;  %1528 = vmatprep.mubr.msk.bf16.mxu0 %vm556_vm3, %v453_v53 }
 0x109   :  { %v314_v60 = vmax.f32 %v265_v51, 0.0  ;;  %v269_v61 = vadd.f32 %v268_v58, %v2037_v56  ;;  %763 = vmatmul.mubr.bf16.gmra.mrb[32].mxu0 %v449_v50  ;;  %921 = vmatprep.subr.bf16.mxu1 %v1783_v1 }
 0x10a   :  { %v315_v62 = vmax.f32 %v267_v57, 0.0 }
 0x10b   :  { %v316_v0 = vmax.f32 %v269_v61, 0.0 }
 0x10c   :  { %v335_v2 = vpack.c.bf16 %v315_v62, %v313_v54  ;;  %922 = vmatpush1.bf16.msra.mxu1 %v1746_v59 }
 0x10d   :  { %v336_v5 = vpack.c.bf16 %v316_v0, %v314_v60  ;;  %v272_v6 = vpop.f32.mrb[16].mxu0  ;;  %923 = vmatprep.subr.bf16.mxu1 %v1783_v1 }
 0x10e   :  { %v433_v7 = vrot.slane %v335_v2, 4  ;;  %v273_v8 = vadd.f32 %v272_v6, %v2035_v55  ;;  %v274_v9 = vpop.f32.mrb[17].mxu0  ;;  %v2087_v10 = vsel %vm440_vm2, %v792_v63, %v335_v2  ;;  %v1752_v2 = vld [vmem:[%s2268_s5 + $0x40] sm:$0xff]  }
 0x10f   :  { %v434_v11 = vrot.slane %v336_v5, 4  ;;  %v275_v12 = vadd.f32 %v274_v9, %v2037_v56  ;;  %v276_v13 = vpop.f32.mrb[18].mxu0  ;;  %v2091_v14 = vsel %vm440_vm2, %v793_v4, %v336_v5 }
 0x110   :  { %v317_v15 = vmax.f32 %v273_v8, 0.0  ;;  %v277_v16 = vadd.f32 %v276_v13, %v2035_v55  ;;  %924 = vmatpush1.bf16.msra.mxu1 %v1747_v3  ;;  %v278_v17 = vpop.f32.mrb[19].mxu0  ;;  %v464_v18 = vsel %vm440_vm2, %v333_v44, %v433_v7  ;;  %v1753_v8 = vld [vmem:[%s2268_s5 + $0x48] sm:$0xff]  }
 0x111   :  { %v318_v20 = vmax.f32 %v275_v12, 0.0  ;;  %v279_v21 = vadd.f32 %v278_v17, %v2037_v56  ;;  %v466_v22 = vsel %vm440_vm2, %v334_v46, %v434_v11  ;;  %925 = vmatprep.subr.bf16.mxu1 %v1783_v1  ;;  %v1756_v12 = vld [vmem:[%s2268_s5 + $0x60] sm:$0xff]   ;;  %v1757_v13 = vld [vmem:[%s2268_s5 + $0x68] sm:$0xff]  }
 0x112   :  { %v319_v23 = vmax.f32 %v277_v16, 0.0  ;;  %1508 = vmatprep.mubr.msk.bf16.mxu1 %vm556_vm3, %v466_v22  ;;  %v1762_v16 = vld [vmem:[%s2270_s7 + $0x18] sm:$0xff]   ;;  %v1763_v17 = vld [vmem:[%s2271_s8 + $0x8] sm:$0xff]   ;;  %v1768_v22 = vld [vmem:[%s2270_s7 + $0x30] sm:$0xff]  }
 0x113   :  { %v320_v24 = vmax.f32 %v279_v21, 0.0  ;;  %607 = vmatmul.mubr.bf16.gmra.mrb[4].mxu1 %v464_v18  ;;  %v1764_v18 = vld [vmem:[%s2270_s7 + $0x20] sm:$0xff]   ;;  %v1767_v21 = vld [vmem:[%s2271_s8 + $0x18] sm:$0xff]  }
 0x114   :  { %v337_v25 = vpack.c.bf16 %v319_v23, %v317_v15  ;;  %926 = vmatpush1.bf16.msra.mxu1 %v1748_v19  ;;  %v1765_v19 = vld [vmem:[%s2271_s8 + $0x10] sm:$0xff]   ;;  %v1769_v23 = vld [vmem:[%s2271_s8 + $0x20] sm:$0xff]  }
 0x115   :  { %v338_v27 = vpack.c.bf16 %v320_v24, %v318_v20  ;;  %v282_v28 = vpop.f32.mrb[20].mxu0  ;;  %927 = vmatprep.subr.bf16.mxu1 %v1783_v1  ;;  %v1766_v20 = vld [vmem:[%s2270_s7 + $0x28] sm:$0xff]   ;;  %v2203_v24 = vld [vmem:[%s2272_s9] sm:$0xff]  }
 0x116   :  { %v283_v30 = vadd.f32 %v282_v28, %v2035_v55  ;;  %v284_v31 = vpop.f32.mrb[21].mxu0  ;;  %v456_v32 = vsel %vm440_vm2, %v433_v7, %v337_v25  ;;  %v796_v44 = vrot.slane %v337_v25, 4 }
 0x117   :  { %v285_v34 = vadd.f32 %v284_v31, %v2037_v56  ;;  %v286_v35 = vpop.f32.mrb[22].mxu0  ;;  %v460_v36 = vsel %vm440_vm2, %v434_v11, %v338_v27  ;;  %v797_v48 = vrot.slane %v338_v27, 4  ;;  %v1755_v11 = vld [vmem:[%s2268_s5 + $0x58] sm:$0xff]  }
 0x118   :  { %v321_v37 = vmax.f32 %v283_v30, 0.0  ;;  %v287_v38 = vadd.f32 %v286_v35, %v2035_v55  ;;  %928 = vmatpush1.bf16.msra.mxu1 %v1749_v26  ;;  %v288_v39 = vpop.f32.mrb[23].mxu0  ;;  %1529 = vmatprep.mubr.msk.bf16.mxu0 %vm556_vm3, %v460_v36  ;;  %v1773_v26 = vld [vmem:[%s2271_s8 + $0x30] sm:$0xff]  }
 0x119   :  { %v322_v41 = vmax.f32 %v285_v34, 0.0  ;;  %v289_v42 = vadd.f32 %v288_v39, %v2037_v56  ;;  %771 = vmatmul.mubr.bf16.gmra.mrb[36].mxu0 %v456_v32  ;;  %929 = vmatprep.subr.bf16.mxu1 %v1783_v1 }
 0x11a   :  { %v323_v43 = vmax.f32 %v287_v38, 0.0 }
 0x11b   :  { %v324_v45 = vmax.f32 %v289_v42, 0.0 }
 0x11c   :  { %v339_v46 = vpack.c.bf16 %v323_v43, %v321_v37  ;;  %930 = vmatpush1.bf16.msra.mxu1 %v1750_v40 }
 0x11d   :  { %v340_v49 = vpack.c.bf16 %v324_v45, %v322_v41  ;;  %931 = vmatprep.subr.bf16.mxu1 %v1783_v1  ;;  %v292_v50 = vpop.f32.mrb[24].mxu0 }
 0x11e   :  { %v293_v51 = vadd.f32 %v292_v50, %v2035_v55  ;;  %v294_v52 = vpop.f32.mrb[25].mxu0  ;;  %v437_v53 = vrot.slane %v339_v46, 4  ;;  %v819_v54 = vsel %vm440_vm2, %v796_v44, %v339_v46 }
 0x11f   :  { %v438_v57 = vrot.slane %v340_v49, 4  ;;  %v295_v58 = vadd.f32 %v294_v52, %v2037_v56  ;;  %v296_v59 = vpop.f32.mrb[26].mxu0  ;;  %v823_v60 = vsel %vm440_vm2, %v797_v48, %v340_v49 }
 0x120   :  { %932 = vmatpush1.bf16.msra.mxu1 %v1751_v47  ;;  %v325_v61 = vmax.f32 %v293_v51, 0.0  ;;  %v297_v62 = vadd.f32 %v296_v59, %v2035_v55  ;;  %v298_v63 = vpop.f32.mrb[27].mxu0  ;;  %v468_v0 = vsel %vm440_vm2, %v337_v25, %v437_v53  ;;  %v1771_v25 = vld [vmem:[%s2271_s8 + $0x28] sm:$0xff]  }
 0x121   :  { %v326_v3 = vmax.f32 %v295_v58, 0.0  ;;  %1530 = vmatprep.mubr.msk.bf16.mxu0 %vm556_vm3, %v438_v57  ;;  %v471_v4 = vsel %vm440_vm2, %v338_v27, %v438_v57  ;;  %933 = vmatprep.subr.bf16.mxu1 %v1783_v1  ;;  %v299_v5 = vadd.f32 %v298_v63, %v2037_v56  ;;  %v1754_v56 = vld [vmem:[%s2268_s5 + $0x50] sm:$0xff]  }
 0x122   :  { %v327_v6 = vmax.f32 %v297_v62, 0.0  ;;  %1509 = vmatprep.mubr.msk.bf16.mxu1 %vm556_vm3, %v471_v4  ;;  %779 = vmatmul.mubr.bf16.gmra.mrb[40].mxu0 %v437_v53 }
 0x123   :  { %v328_v55 = vmax.f32 %v299_v5, 0.0  ;;  %615 = vmatmul.mubr.bf16.gmra.mrb[8].mxu1 %v468_v0 }
 0x124   :  { %v341_v7 = vpack.c.bf16 %v327_v6, %v325_v61  ;;  %934 = vmatpush1.bf16.msra.mxu1 %v1752_v2 }
 0x125   :  { %v342_v9 = vpack.c.bf16 %v328_v55, %v326_v3  ;;  %935 = vmatprep.subr.bf16.mxu1 %v1783_v1 }
 0x126   :  { %v800_v15 = vrot.slane %v341_v7, 4 }
 0x127   :  { %1510 = vmatprep.mubr.msk.bf16.mxu1 %vm556_vm3, %v342_v9 }
 0x128   :  { %936 = vmatpush1.bf16.msra.mxu1 %v1753_v8 }
 0x129   :  { %937 = vmatprep.subr.bf16.mxu1 %v1783_v1 }
 0x12b   :  { %623 = vmatmul.mubr.bf16.gmra.mrb[12].mxu1 %v341_v7  ;;  %v1549_v7 = vld [vmem:[%s2273_s6] ss:$0 sm:$0xff] }
 0x12c   :  { %938 = vmatpush1.bf16.msra.mxu1 %v1754_v56  ;;  %1545 = vmatprep.mubr.msk.bf16.mxu1 %vm556_vm3, %v2056_v33  ;;  %v801_v33 = vrot.slane %v342_v9, 4 }
 0x12d   :  { %939 = vmatprep.subr.bf16.mxu1 %v1783_v1 }
 0x130   :  { %940 = vmatpush1.bf16.msra.mxu1 %v1755_v11 }
 0x131   :  { %941 = vmatprep.subr.bf16.mxu1 %v1783_v1 }
 0x134   :  { %942 = vmatpush1.bf16.msra.mxu1 %v1756_v12 }
 0x135   :  { %943 = vmatprep.subr.bf16.mxu1 %v1783_v1  ;;  %v1758_v1 = vld [vmem:[%s2270_s7] sm:$0xff]  }
 0x136   :  { %1633 = vmatprep.subr.bf16.mxu0 %v1758_v1 }
 0x137   :  { %1634 = vmatpush3.bf16.msra.mxu0 %v1758_v1 }
 0x138   :  { %944 = vmatpush1.bf16.msra.mxu1 %v1757_v13 }
 0x13b   :  { %950 = vmatmul.mubr.bf16.vlgmr.msra.gmra.mrb[16].mxu1 %v2052_v29  ;;  %v1759_v29 = vld [vmem:[%s2270_s7 + $0x8] sm:$0xff]  }
 0x13c   :  { %1546 = vmatprep.mubr.msk.bf16.mxu1 %vm556_vm3, %v2091_v14  ;;  %1635 = vmatprep.subr.bf16.mxu0 %v1759_v29  ;;  %v1761_v14 = vld [vmem:[%s2271_s8] sm:$0xff]  }
 0x13d   :  { %1636 = vmatpush3.bf16.msra.mxu0 %v1759_v29  ;;  %1615 = vmatprep.subr.bf16.mxu1 %v1761_v14 }
 0x13e   :  { %1616 = vmatpush3.bf16.msra.mxu1 %v1761_v14 }
 0x13f   :  { %1617 = vmatprep.subr.bf16.mxu1 %v1763_v17 }
 0x142   :  { %1618 = vmatpush3.bf16.msra.mxu1 %v1763_v17 }
 0x143   :  { %958 = vmatmul.mubr.bf16.gmra.mrb[20].mxu1 %v2087_v10  ;;  %v1760_v10 = vld [vmem:[%s2270_s7 + $0x10] sm:$0xff]   ;;  %1619 = vmatprep.subr.bf16.mxu1 %v1765_v19 }
 0x144   :  { %1547 = vmatprep.mubr.msk.bf16.mxu1 %vm556_vm3, %v823_v60  ;;  %1637 = vmatprep.subr.bf16.mxu0 %v1760_v10 }
 0x145   :  { %1638 = vmatpush3.bf16.msra.mxu0 %v1760_v10 }
 0x146   :  { %1639 = vmatprep.subr.bf16.mxu0 %v1762_v16  ;;  %1620 = vmatpush3.bf16.msra.mxu1 %v1765_v19 }
 0x147   :  { %1621 = vmatprep.subr.bf16.mxu1 %v1767_v21 }
 0x149   :  { %1640 = vmatpush3.bf16.msra.mxu0 %v1762_v16 }
 0x14a   :  { %1641 = vmatprep.subr.bf16.mxu0 %v1764_v18  ;;  %1622 = vmatpush3.bf16.msra.mxu1 %v1767_v21 }
 0x14b   :  { %966 = vmatmul.mubr.bf16.gmra.mrb[24].mxu1 %v819_v54  ;;  %1623 = vmatprep.subr.bf16.mxu1 %v1769_v23 }
 0x14c   :  { %1548 = vmatprep.mubr.msk.bf16.mxu1 %vm556_vm3, %v801_v33 }
 0x14d   :  { %1642 = vmatpush3.bf16.msra.mxu0 %v1764_v18 }
 0x14e   :  { %1643 = vmatprep.subr.bf16.mxu0 %v1766_v20  ;;  %1624 = vmatpush3.bf16.msra.mxu1 %v1769_v23 }
 0x14f   :  { %1625 = vmatprep.subr.bf16.mxu1 %v1771_v25 }
 0x151   :  { %1644 = vmatpush3.bf16.msra.mxu0 %v1766_v20 }
 0x152   :  { %1645 = vmatprep.subr.bf16.mxu0 %v1768_v22  ;;  %1626 = vmatpush3.bf16.msra.mxu1 %v1771_v25 }
 0x153   :  { %974 = vmatmul.mubr.bf16.gmra.mrb[28].mxu1 %v800_v15  ;;  %1627 = vmatprep.subr.bf16.mxu1 %v1773_v26 }
 0x155   :  { %1646 = vmatpush3.bf16.msra.mxu0 %v1768_v22 }
 0x156   :  { %1651 = vmatprep.subr.bf16.mxu0 %v2203_v24  ;;  %1628 = vmatpush3.bf16.msra.mxu1 %v1773_v26 }
 0x1cc   :  { %v756_v27 = vpop.f32.mrb[28].mxu0 }
 0x1cd   :  { %v758_v28 = vpop.f32.mrb[29].mxu0 }
 0x1ce   :  { %v759_v30 = vpop.f32.mrb[30].mxu0 }
 0x1cf   :  { %v761_v31 = vpop.f32.mrb[31].mxu0 }
 0x1d6   :  { %v600_v32 = vpop.f32.mrb[0].mxu1 }
 0x1d7   :  { %v757_v34 = vadd.f32 %v756_v27, %v600_v32  ;;  %v602_v35 = vpop.f32.mrb[1].mxu1 }
 0x1d8   :  { %v603_v36 = vpop.f32.mrb[2].mxu1 }
 0x1d9   :  { %v760_v37 = vadd.f32 %v759_v30, %v603_v36  ;;  %v605_v38 = vpop.f32.mrb[3].mxu1 }
 0x1dc   :  { %v764_v39 = vpop.f32.mrb[32].mxu0 }
 0x1dd   :  { %v766_v40 = vpop.f32.mrb[33].mxu0 }
 0x1de   :  { %v767_v41 = vpop.f32.mrb[34].mxu0 }
 0x1df   :  { %v769_v42 = vpop.f32.mrb[35].mxu0 }
 0x1e6   :  { %v608_v43 = vpop.f32.mrb[4].mxu1 }
 0x1e7   :  { %v765_v44 = vadd.f32 %v764_v39, %v608_v43  ;;  %v610_v45 = vpop.f32.mrb[5].mxu1 }
 0x1e8   :  { %v611_v46 = vpop.f32.mrb[6].mxu1 }
 0x1e9   :  { %v768_v47 = vadd.f32 %v767_v41, %v611_v46  ;;  %v613_v48 = vpop.f32.mrb[7].mxu1 }
 0x1ea   :  { %v1772_v48 = vld [vmem:[%s2272_s9 + $0x8] sm:$0xff]  }
 0x1ec   :  { %v772_v49 = vpop.f32.mrb[36].mxu0 }
 0x1ed   :  { %v774_v50 = vpop.f32.mrb[37].mxu0 }
 0x1ee   :  { %v775_v51 = vpop.f32.mrb[38].mxu0 }
 0x1ef   :  { %v777_v52 = vpop.f32.mrb[39].mxu0 }
 0x1f5   :  { %v780_v53 = vpop.f32.mrb[40].mxu0 }
 0x1f6   :  { %v616_v54 = vpop.f32.mrb[8].mxu1  ;;  %v782_v57 = vpop.f32.mrb[41].mxu0 }
 0x1f7   :  { %v773_v58 = vadd.f32 %v772_v49, %v616_v54  ;;  %v618_v59 = vpop.f32.mrb[9].mxu1  ;;  %v783_v60 = vpop.f32.mrb[42].mxu0 }
 0x1f8   :  { %v619_v61 = vpop.f32.mrb[10].mxu1  ;;  %v784_v62 = vpop.f32.mrb[43].mxu0  ;;  %v1777_v60 = vld [vmem:[%s2272_s9 + $0x28] sm:$0xff]  }
 0x1f9   :  { %v776_v63 = vadd.f32 %v775_v51, %v619_v61  ;;  %v621_v0 = vpop.f32.mrb[11].mxu1  ;;  %v1778_v61 = vld [vmem:[%s2272_s9 + $0x30] sm:$0xff]  }
 0x1fa   :  { %v1779_v0 = vld [vmem:[%s2274_s11] sm:$0xff]  }
 0x1fe   :  { %v624_v2 = vpop.f32.mrb[12].mxu1 }
 0x1ff   :  { %v781_v3 = vadd.f32 %v780_v53, %v624_v2  ;;  %v626_v4 = vpop.f32.mrb[13].mxu1  ;;  %v1774_v53 = vld [vmem:[%s2272_s9 + $0x10] sm:$0xff]   ;;  %v1784_v2 = vmov 0.0  }
 0x200   :  { %v627_v5 = vpop.f32.mrb[14].mxu1  ;;  %v1781_v4 = vld [vmem:[%s2274_s11 + $0x10] sm:$0xff]  }
 0x201   :  { %v628_v6 = vpop.f32.mrb[15].mxu1  ;;  %v1782_v5 = vld [vmem:[%s2274_s11 + $0x18] sm:$0xff]  }
 0x20e   :  { %v951_v55 = vpop.f32.mrb[16].mxu1 }
 0x20f   :  { %v981_v8 = vadd.f32 %v951_v55, %v757_v34  ;;  %v953_v9 = vpop.f32.mrb[17].mxu1 }
 0x210   :  { %v954_v56 = vpop.f32.mrb[18].mxu1 }
 0x211   :  { %v995_v11 = vadd.f32 %v1549_v7, %v981_v8  ;;  %v982_v12 = vadd.f32 %v954_v56, %v760_v37  ;;  %v956_v13 = vpop.f32.mrb[19].mxu1 }
 0x213   :  { %v996_v33 = vadd.f32 %v1549_v7, %v982_v12  ;;  %v1002_v15 = vmax.f32 %v995_v11, 0.0  ;;  %v1577_v11 = vld [vmem:[%s2275_s10] ss:$0 sm:$0xff] }
 0x215   :  { %v1003_v1 = vmax.f32 %v996_v33, 0.0 }
 0x216   :  { %v959_v29 = vpop.f32.mrb[20].mxu1 }
 0x217   :  { %v1009_v10 = vpack.c.bf16 %v1003_v1, %v1002_v15  ;;  %v983_v14 = vadd.f32 %v959_v29, %v765_v44  ;;  %v961_v16 = vpop.f32.mrb[21].mxu1 }
 0x218   :  { %v962_v17 = vpop.f32.mrb[22].mxu1 }
 0x219   :  { %v997_v18 = vadd.f32 %v1549_v7, %v983_v14  ;;  %v984_v19 = vadd.f32 %v962_v17, %v768_v47  ;;  %v964_v20 = vpop.f32.mrb[23].mxu1  ;;  %v1058_v21 = vsel %vm440_vm2, 0, %v1009_v10  ;;  %v1259_v31 = vrot.slane %v1009_v10, 4 }
 0x21a   :  { %1647 = vmatprep.mubr.msk.bf16.mxu0 %vm1109_vm5, %v1058_v21 }
 0x21b   :  { %v998_v22 = vadd.f32 %v1549_v7, %v984_v19  ;;  %v1004_v23 = vmax.f32 %v997_v18, 0.0 }
 0x21d   :  { %v1005_v25 = vmax.f32 %v998_v22, 0.0 }
 0x21e   :  { %v967_v26 = vpop.f32.mrb[24].mxu1 }
 0x21f   :  { %v1010_v27 = vpack.c.bf16 %v1005_v25, %v1004_v23  ;;  %v985_v28 = vadd.f32 %v967_v26, %v773_v58  ;;  %v969_v30 = vpop.f32.mrb[25].mxu1  ;;  %v1775_v58 = vld [vmem:[%s2272_s9 + $0x18] sm:$0xff]  }
 0x220   :  { %v970_v32 = vpop.f32.mrb[26].mxu1 }
 0x221   :  { %v1056_v34 = vrot.slane %v1010_v27, 4  ;;  %v999_v35 = vadd.f32 %v1549_v7, %v985_v28  ;;  %v986_v36 = vadd.f32 %v970_v32, %v776_v63  ;;  %v972_v37 = vpop.f32.mrb[27].mxu1  ;;  %v1264_v38 = vsel %vm440_vm2, %v1259_v31, %v1010_v27 }
 0x223   :  { %v1000_v39 = vadd.f32 %v1549_v7, %v986_v36  ;;  %v1064_v40 = vsel %vm440_vm2, %v1009_v10, %v1056_v34  ;;  %v1006_v41 = vmax.f32 %v999_v35, 0.0 }
 0x224   :  { %1629 = vmatprep.mubr.msk.bf16.mxu1 %vm1109_vm5, %v1064_v40 }
 0x225   :  { %v1007_v42 = vmax.f32 %v1000_v39, 0.0 }
 0x226   :  { %v975_v43 = vpop.f32.mrb[28].mxu1 }
 0x227   :  { %v1011_v44 = vpack.c.bf16 %v1007_v42, %v1006_v41  ;;  %v987_v45 = vadd.f32 %v975_v43, %v781_v3  ;;  %v977_v46 = vpop.f32.mrb[29].mxu1  ;;  %v1780_v3 = vld [vmem:[%s2274_s11 + $0x8] sm:$0xff]  }
 0x228   :  { %v978_v47 = vpop.f32.mrb[30].mxu1 }
 0x229   :  { %v1001_v49 = vadd.f32 %v1549_v7, %v987_v45  ;;  %v979_v50 = vpop.f32.mrb[31].mxu1  ;;  %v1061_v51 = vsel %vm440_vm2, %v1056_v34, %v1011_v44  ;;  %v1261_v62 = vrot.slane %v1011_v44, 4 }
 0x22a   :  { %1648 = vmatmul.mubr.msk.bf16.vlgmr.msra.gmra.mrb[44].mxu0 %vm1109_vm5, %v1061_v51 }
 0x22b   :  { %v1008_v52 = vmax.f32 %v1001_v49, 0.0  ;;  %1652 = vmatpush3.bf16.msra.mxu0 %v2203_v24  ;;  %1665 = vmatprep.mubr.msk.bf16.mxu0 %vm1109_vm5, %v1264_v38  ;;  %v1776_v24 = vld [vmem:[%s2272_s9 + $0x20] sm:$0xff]   ;;  %v1266_v63 = vsel %vm440_vm2, %v1261_v62, 0 }
 0x22c   :  { %1653 = vmatprep.subr.bf16.mxu0 %v1772_v48 }
 0x22d   :  { %v1012_v54 = vpack.c.bf16 %v1008_v52, %v1008_v52 }
 0x22f   :  { %v1063_v57 = vrot.slane %v1012_v54, 4  ;;  %1654 = vmatpush3.bf16.msra.mxu0 %v1772_v48 }
 0x230   :  { %1655 = vmatprep.subr.bf16.mxu0 %v1774_v53 }
 0x231   :  { %v1066_v59 = vsel %vm440_vm2, %v1011_v44, %v1063_v57 }
 0x232   :  { %1630 = vmatmul.mubr.msk.bf16.vlgmr.msra.gmra.mrb[32].mxu1 %vm1109_vm5, %v1066_v59 }
 0x233   :  { %1656 = vmatpush3.bf16.msra.mxu0 %v1774_v53 }
 0x234   :  { %1657 = vmatprep.subr.bf16.mxu0 %v1775_v58 }
 0x237   :  { %1658 = vmatpush3.bf16.msra.mxu0 %v1775_v58 }
 0x238   :  { %1659 = vmatprep.subr.bf16.mxu0 %v1776_v24 }
 0x23b   :  { %1660 = vmatpush3.bf16.msra.mxu0 %v1776_v24 }
 0x23c   :  { %1661 = vmatprep.subr.bf16.mxu0 %v1777_v60 }
 0x23f   :  { %1662 = vmatpush3.bf16.msra.mxu0 %v1777_v60 }
 0x240   :  { %1663 = vmatprep.subr.bf16.mxu0 %v1778_v61 }
 0x243   :  { %1664 = vmatpush3.bf16.msra.mxu0 %v1778_v61 }
 0x244   :  { %1669 = vmatprep.subr.bf16.mxu0 %v1784_v2 }
 0x246   :  { %1666 = vmatmul.mubr.msk.bf16.vlgmr.msra.gmra.mrb[44].mxu0 %vm1109_vm5, %v1266_v63 }
 0x247   :  { %1670 = vmatpush3.bf16.msra.mxu0 %v1779_v0  ;;  %1677 = vmatprep.mubr.msk.bf16.mxu0 %vm1785_vm6, %v1784_v2 }
 0x248   :  { %1671 = vmatprep.subr.bf16.mxu0 %v1784_v2 }
 0x24b   :  { %1672 = vmatpush3.bf16.msra.mxu0 %v1780_v3 }
 0x24c   :  { %1673 = vmatprep.subr.bf16.mxu0 %v1784_v2 }
 0x24f   :  { %1674 = vmatpush3.bf16.msra.mxu0 %v1781_v4 }
 0x250   :  { %1675 = vmatprep.subr.bf16.mxu0 %v1784_v2 }
 0x253   :  { %1676 = vmatpush3.bf16.msra.mxu0 %v1782_v5 }
 0x305   :  { %v1631_v6 = vpop.f32.mrb[32].mxu1 }
 0x306   :  { %v1148_v55 = vpop.f32.mrb[33].mxu1 }
 0x307   :  { %v1632_v7 = vpop.f32.mrb[34].mxu1 }
 0x308   :  { %v1151_v8 = vpop.f32.mrb[35].mxu1 }
 0x319   :  { %v1667_v9 = vpop.f32.mrb[44].mxu0 }
 0x31a   :  { %v1681_v56 = vadd.f32 %v1667_v9, %v1631_v6  ;;  %v1347_v12 = vpop.f32.mrb[45].mxu0 }
 0x31b   :  { %v1682_v13 = vadd.f32 %v1347_v12, %v1148_v55  ;;  %v1668_v33 = vpop.f32.mrb[46].mxu0 }
 0x31c   :  { %v1683_v15 = vadd.f32 %v1668_v33, %v1632_v7  ;;  %v1350_v1 = vpop.f32.mrb[47].mxu0  ;;  %v1375_v14 = vadd.f32 %v1681_v56, %v1577_v11 }
 0x31d   :  { %v1373_v29 = vadd.f32 %v1682_v13, %v1577_v11  ;;  %v1684_v10 = vadd.f32 %v1350_v1, %v1151_v8 }
 0x31e   :  { %v1376_v18 = vadd.f32 %v1683_v15, %v1577_v11  ;;  %v1379_v20 = vmax.f32 %v1375_v14, 0.0 }
 0x31f   :  { %v1374_v16 = vadd.f32 %v1684_v10, %v1577_v11  ;;  %v1377_v17 = vmax.f32 %v1373_v29, 0.0 }
 0x320   :  { %v1380_v22 = vmax.f32 %v1376_v18, 0.0 }
 0x321   :  { %v1378_v19 = vmax.f32 %v1374_v16, 0.0 }
 0x323   :  { %v1381_v21 = vadd.f32 %v1378_v19, %v1377_v17 }
 0x325   :  { %v1382_v23 = vadd.f32 %v1381_v21, %v1379_v20 }
 0x327   :  { %v1383_v25 = vadd.f32 %v1382_v23, %v1380_v22 }
 0x329   :  { %v1384_v26 = vpack.c.bf16 %v1383_v25, %v1383_v25 }
 0x32b   :  { %1678 = vmatmul.mubr.msk.bf16.vlgmr.msra.gmra.mrb[48].mxu0 %vm1417_vm7, %v1384_v26 }
 0x3fe   :  { %v1455_v27 = vpop.f32.mrb[48].mxu0 }
 0x3ff   :  { %1461 = vst [vmem:[%s2276_s12] sm:$0xff] %v1455_v27  ;;  %v1679_v28 = vpop.f32.mrb[49].mxu0 }
 0x400   :  { %v1458_v30 = vpop.f32.mrb[50].mxu0 }
 0x401   :  { %v1680_v31 = vpop.f32.mrb[51].mxu0 }

</bundles_post_ra>
